<compile_context>
chip_gen: v7x
topology: tpu7x:2x2x1
jax: 0.10.0
libtpu: 0.0.40
codegen_flags: <defaults>
</compile_context>

<pallas_src>
import functools

import jax
import jax.numpy as jnp
from jax.experimental import pallas as pl
from jax.experimental.pallas import tpu as pltpu


# ----------------------------------------------------------------------------------- #
# Per-generation tile / VMEM-limit selection (trace-time).
# ----------------------------------------------------------------------------------- #
def _tpu_kernel_config():
    vmem_bytes = None
    try:
        vmem_bytes = int(pltpu.get_tpu_info().vmem_capacity_bytes)
    except Exception:
        pass
    kind = ""
    try:
        kind = jax.devices()[0].device_kind.lower()
    except Exception:
        pass

    is_v7 = (vmem_bytes is not None and vmem_bytes <= 64 * 1024 * 1024) or ("v7" in kind)
    is_v5 = "v5" in kind

    if is_v7:                       # 64 MiB physical VMEM: keep headroom, smaller Q tile
        return 128, 44 * 1024 * 1024
    if is_v5:                       # 4x128 MXU already saturated at 128 rows
        return 128, 96 * 1024 * 1024
    if vmem_bytes is not None and vmem_bytes >= 100 * 1024 * 1024:
        return 256, 96 * 1024 * 1024
    if kind:                        # known non-v5/v7 TPU (v4 / v6e): 128 MiB VMEM
        return 256, 96 * 1024 * 1024
    return 128, 40 * 1024 * 1024    # unknown hardware: conservative


# ----------------------------------------------------------------------------------- #
# Pass 1: per-head projection, run once per token (NOT per Q tile).
#   x2: (rows, D) with rows = N * L * heads ;  w_t: (D, D) = W^T (scale pre-folded for Q)
# ----------------------------------------------------------------------------------- #
def _proj_kernel(x_ref, w_ref, o_ref):
    o_ref[...] = jnp.dot(
        x_ref[...], w_ref[...], preferred_element_type=jnp.float32
    ).astype(o_ref.dtype)


def _head_projection(x, w_t, heads, *, tile_rows=512):
    N, L, E = x.shape
    D = E // heads
    rows = N * L * heads
    x2 = x.reshape(rows, D)                       # contiguous reshape: free on the host side
    tr = min(tile_rows, rows)

    out = pl.pallas_call(
        _proj_kernel,
        out_shape=jax.ShapeDtypeStruct((rows, D), x.dtype),
        grid_spec=pltpu.PrefetchScalarGridSpec(
            num_scalar_prefetch=0,
            grid=(pl.cdiv(rows, tr),),
            in_specs=[
                pl.BlockSpec((tr, D), lambda i: (i, 0)),
                pl.BlockSpec((D, D), lambda i: (0, 0)),
            ],
            out_specs=pl.BlockSpec((tr, D), lambda i: (i, 0)),
        ),
        compiler_params=pltpu.CompilerParams(dimension_semantics=("parallel",)),
    )(x2, w_t)
    return out.reshape(N, L, E)


# ----------------------------------------------------------------------------------- #
# Pass 2: attention core + fc_out.  One grid step == (one batch element, one Lq tile).
# Inputs are already head-projected (and Q already scaled by 1/sqrt(E)).
# ----------------------------------------------------------------------------------- #
def _mha_attention_kernel(qp_ref, kp_ref, vp_ref, wo_ref, bo_ref, o_ref, *,
                          heads, head_dim):
    cdt = qp_ref.dtype               # MXU compute dtype (bf16 stays bf16, f32 stays f32)

    q = qp_ref[0]                    # (TQ, E)   scaled, projected queries
    k = kp_ref[0]                    # (Lk, E)   projected keys
    v = vp_ref[0]                    # (Lv, E)   projected values

    dn = (((1,), (1,)), ((), ()))    # contract last dims -> q_h @ k_h^T, no transpose

    # NOTE: when head_dim % 128 != 0 these lane slices cross vreg lane tiles (masked
    # loads); for lane-free slicing, pad head_dim to 128 or lay heads on a leading axis.
    head_outs = []
    for h in range(heads):           # heads is small & static -> unrolled
        lo = h * head_dim
        qh = q[:, lo:lo + head_dim]                                   # (TQ, D)
        kh = k[:, lo:lo + head_dim]                                   # (Lk, D)
        vh = v[:, lo:lo + head_dim]                                   # (Lv, D)

        energy = jax.lax.dot_general(qh, kh, dn,
                                     preferred_element_type=jnp.float32)   # (TQ, Lk)
        # Stable softmax; padded Q rows (Lq % tq != 0) stay finite and their output
        # rows are discarded with the padded output block.
        energy = energy - jnp.max(energy, axis=-1, keepdims=True)
        p = jnp.exp(energy)
        inv_l = pl.reciprocal(jnp.sum(p, axis=-1, keepdims=True), approx=True)
        attn = (p * inv_l).astype(cdt)                                # (TQ, Lk)

        head_outs.append(jnp.dot(attn, vh, preferred_element_type=jnp.float32))

    # Single lane-dense fc_out GEMM: concat heads -> (TQ, E), then (TQ,E) x (E,E).
    concat = jnp.concatenate(head_outs, axis=-1).astype(cdt)          # (TQ, E)
    out = jnp.dot(concat, wo_ref[...], preferred_element_type=jnp.float32) + bo_ref[...]
    o_ref[0] = out.astype(o_ref.dtype)


# ----------------------------------------------------------------------------------- #
# Wrapper: weight prep + projection pass + attention pass.
# ----------------------------------------------------------------------------------- #
def multi_head_attention(values, keys, query, wq, wk, wv, wo, bo, *, heads):
    """values/keys/query: (N, L, E). wq/wk/wv: (D, D). wo: (E, E). bo: (E,)."""
    N, Lq, E = query.shape
    Lk = keys.shape[1]
    Lv = values.shape[1]
    D = E // heads
    assert D * heads == E, "embed_size must be divisible by heads"

    cdt = query.dtype
    scale = 1.0 / (E ** 0.5)                       # reference scales by sqrt(embed_size)

    # Host-side weight prep: transposes, casts, and scale folding (no in-kernel relayout).
    wq_t = (wq.T * scale).astype(cdt)              # (D, D), scale folded into Wq
    wk_t = wk.T.astype(cdt)
    wv_t = wv.T.astype(cdt)
    wo_t = wo.T.astype(cdt)                        # (E, E): fc_out is y = x @ Wo^T + bo
    bo2 = bo.reshape(1, E).astype(jnp.float32)

    # Pass 1: head projections, once per token (shared (D, D) weight -> single GEMM each).
    qp = _head_projection(query, wq_t, heads)      # (N, Lq, E), already scaled
    kp = _head_projection(keys, wk_t, heads)       # (N, Lk, E)
    vp = _head_projection(values, wv_t, heads)     # (N, Lv, E)

    # Pass 2: attention + fc_out.
    tile_q, vmem_limit = _tpu_kernel_config()
    tq = min(tile_q, Lq)
    grid = (N, pl.cdiv(Lq, tq))
    kernel = functools.partial(_mha_attention_kernel, heads=heads, head_dim=D)

    return pl.pallas_call(
        kernel,
        out_shape=jax.ShapeDtypeStruct((N, Lq, E), query.dtype),
        grid_spec=pltpu.PrefetchScalarGridSpec(
            num_scalar_prefetch=0,
            grid=grid,
            in_specs=[
                pl.BlockSpec((1, tq, E), lambda n, qi: (n, qi, 0)),   # projected Q tile
                pl.BlockSpec((1, Lk, E), lambda n, qi: (n, 0, 0)),    # projected K (full)
                pl.BlockSpec((1, Lv, E), lambda n, qi: (n, 0, 0)),    # projected V (full)
                pl.BlockSpec((E, E), lambda n, qi: (0, 0)),           # Wo^T
                pl.BlockSpec((1, E), lambda n, qi: (0, 0)),           # bias (f32)
            ],
            out_specs=pl.BlockSpec((1, tq, E), lambda n, qi: (n, qi, 0)),
        ),
        compiler_params=pltpu.CompilerParams(
            dimension_semantics=("parallel", "parallel"),
            vmem_limit_bytes=vmem_limit,
        ),
    )(qp, kp, vp, wo_t, bo2)


# ----------------------------------------------------------------------------------- #
# Pure-JAX mirror of the PyTorch forward (correctness check).
# ----------------------------------------------------------------------------------- #
def mha_reference(values, keys, query, wq, wk, wv, wo, bo, *, heads):
    N, Lq, E = query.shape
    D = E // heads
    v4 = values.reshape(N, -1, heads, D)
    k4 = keys.reshape(N, -1, heads, D)
    q4 = query.reshape(N, Lq, heads, D)
    vp = jnp.einsum('nlhd,od->nlho', v4, wv)
    kp = jnp.einsum('nlhd,od->nlho', k4, wk)
    qp = jnp.einsum('nqhd,od->nqho', q4, wq)
    energy = jnp.einsum('nqhd,nkhd->nhqk', qp, kp)
    attn = jax.nn.softmax(energy / (E ** 0.5), axis=3)
    out = jnp.einsum('nhql,nlhd->nqhd', attn, vp).reshape(N, Lq, E)
    return out @ wo.T + bo


if __name__ == "__main__":
    # Small shapes consistent with the module: embed divisible by heads.
    N, L, E, heads = 2, 8, 32, 4
    D = E // heads

    key = jax.random.PRNGKey(0)
    kx, kq, kk, kv, kw, kb = jax.random.split(key, 6)

    # Self-attention: same tensor for values/keys/query (like the torch example).
    x = jax.random.uniform(kx, (N, L, E), dtype=jnp.float32)

    # Deterministic parameter init (shapes from MultiHeadAttention.__init__).
    wq = jax.random.normal(kq, (D, D), dtype=jnp.float32) * (1.0 / D ** 0.5)
    wk = jax.random.normal(kk, (D, D), dtype=jnp.float32) * (1.0 / D ** 0.5)
    wv = jax.random.normal(kv, (D, D), dtype=jnp.float32) * (1.0 / D ** 0.5)
    wo = jax.random.normal(kw, (E, E), dtype=jnp.float32) * (1.0 / E ** 0.5)
    bo = jax.random.normal(kb, (E,), dtype=jnp.float32) * 0.01

    out = multi_head_attention(x, x, x, wq, wk, wv, wo, bo, heads=heads)
    out = jax.block_until_ready(out)

    ref = mha_reference(x, x, x, wq, wk, wv, wo, bo, heads=heads)
    assert out.shape == (N, L, E)
    # Tolerance relaxed slightly for the EUP approximate-reciprocal softmax divide.
    assert jnp.allclose(out, ref, atol=5e-3, rtol=5e-3), \
        f"max abs err {jnp.max(jnp.abs(out - ref))}"

    print("KERNEL_OK")
</pallas_src>

<mosaic_0001>
module attributes {stable_mosaic.version = 11 : i64} {
  func.func @_proj_kernel(%arg0: i32, %arg1: memref<64x8xf32, #tpu.memory_space<vmem>>, %arg2: memref<8x8xf32, #tpu.memory_space<vmem>>, %arg3: memref<64x8xf32, #tpu.memory_space<vmem>>) attributes {dimension_semantics = [#tpu.dimension_semantics<parallel>], iteration_bounds = array<i64: 1>, scalar_prefetch = 0 : i64, scratch_operands = 0 : i64, tpu.core_type = #tpu.core_type<tc>, window_params = [{transform_indices = @transform_0, window_bounds = array<i64: 64, 8>}, {pipeline_mode = #tpu.pipeline_mode<synchronous>, transform_indices = @transform_1, window_bounds = array<i64: 8, 8>}, {transform_indices = @transform_2, window_bounds = array<i64: 64, 8>}]} {
    %c0 = arith.constant 0 : index
    %c0_0 = arith.constant 0 : index
    %0 = vector.load %arg1[%c0, %c0_0] : memref<64x8xf32, #tpu.memory_space<vmem>>, vector<64x8xf32>
    %c0_1 = arith.constant 0 : index
    %c0_2 = arith.constant 0 : index
    %1 = vector.load %arg2[%c0_1, %c0_2] : memref<8x8xf32, #tpu.memory_space<vmem>>, vector<8x8xf32>
    %cst = arith.constant dense<0.000000e+00> : vector<64x8xf32>
    %2 = tpu.matmul %0, %1, %cst {dimension_numbers = #tpu.dot_dimension_numbers<[1], [0], [0], [1], [0, 0, 1, 1], [], []>} : vector<64x8xf32>, vector<8x8xf32>, vector<64x8xf32> -> vector<64x8xf32>
    %c0_3 = arith.constant 0 : index
    %c0_4 = arith.constant 0 : index
    %3 = vector.load %arg3[%c0_3, %c0_4] : memref<64x8xf32, #tpu.memory_space<vmem>>, vector<64x8xf32>
    tpu.vector_store %arg3[%c0_3, %c0_4], %2 {strides = array<i32>} : memref<64x8xf32, #tpu.memory_space<vmem>>, vector<64x8xf32>,
    return
  }
  func.func @transform_0(%arg0: i32) -> (i32, i32) {
    %c0_i32 = arith.constant 0 : i32
    %c0_i32_0 = arith.constant 0 : i32
    return %arg0, %c0_i32 : i32, i32
  }
  func.func @transform_1(%arg0: i32) -> (i32, i32) {
    %c0_i32 = arith.constant 0 : i32
    %c0_i32_0 = arith.constant 0 : i32
    %c0_i32_1 = arith.constant 0 : i32
    return %c0_i32, %c0_i32_0 : i32, i32
  }
  func.func @transform_2(%arg0: i32) -> (i32, i32) {
    %c0_i32 = arith.constant 0 : i32
    %c0_i32_0 = arith.constant 0 : i32
    return %arg0, %c0_i32 : i32, i32
  }
}

</mosaic_0001>

<bundles_post_ra>
// kernel: tpu_custom_call.1
= control target key start
LH: loop header
LB: loop body
LE: loop exit
PB: predicated region body
PF: predicated region fallthrough
CT: control target
= control target key end

     0   :  { %vm20_vm0 = vcmask 64512   ;;  %s277_s1 = inlined_call_operand.vmem [shape: f32[8,8], index: 1, kind: input, shape index: {}]   ;;  %s278_s0 = inlined_call_operand.vmem [shape: f32[64,8], index: 0, kind: input, shape index: {}]   ;;  %s279_s2 = inlined_call_operand.vmem [shape: f32[64,8], index: 2, kind: output, shape index: {}]  }
   0x1   :  { %v19_v0 = vld [vmem:[%s277_s1] sm:$0xff]  ;;  %v12_v3 = vld [vmem:[%s278_s0 + $0x8] sm:$0xff]  ;;  %v13_v5 = vld [vmem:[%s278_s0 + $0x10] sm:$0xff] }
   0x2   :  { %v11_v1 = vld [vmem:[%s278_s0] sm:$0xff]  ;;  %179 = vmatprep.subr.mxu0 %v19_v0  ;;  %193 = vmatprep.subr.mxu1 %v19_v0  ;;  %v16_v4 = vld [vmem:[%s278_s0 + $0x28] sm:$0xff]  ;;  %v17_v6 = vld [vmem:[%s278_s0 + $0x30] sm:$0xff] }
   0x3   :  { %v15_v2 = vld [vmem:[%s278_s0 + $0x20] sm:$0xff]  ;;  %180 = vmatpush3.msra.mxu0 %v19_v0  ;;  %194 = vmatpush3.msra.mxu1 %v19_v0  ;;  %v14_v7 = vld [vmem:[%s278_s0 + $0x18] sm:$0xff] }
   0x4   :  { %181 = vmatprep.mubr.msk.f32.mxu0 %vm20_vm0, %v11_v1  ;;  %187 = vmatprep.mubr.msk.f32.mxu1 %vm20_vm0, %v15_v2  ;;  %v18_v8 = vld [vmem:[%s278_s0 + $0x38] sm:$0xff] }
   0x5   :  { %182 = vmatmul.mubr.msk.f32.vlgmr.msra.gmra.mrb[0].mxu0 %vm20_vm0, %v12_v3  ;;  %188 = vmatmul.mubr.msk.f32.vlgmr.msra.gmra.mrb[0].mxu1 %vm20_vm0, %v16_v4 }
   0x6   :  { %184 = vmatprep.mubr.msk.f32.mxu0 %vm20_vm0, %v13_v5  ;;  %190 = vmatprep.mubr.msk.f32.mxu1 %vm20_vm0, %v17_v6 }
   0x9   :  { %185 = vmatmul.mubr.msk.f32.gmra.mrb[2].mxu0 %vm20_vm0, %v14_v7  ;;  %191 = vmatmul.mubr.msk.f32.gmra.mrb[2].mxu1 %vm20_vm0, %v18_v8 }
  0xd8   :  { %v183_v9 = vpop.f32.mrb[0].mxu0  ;;  %v189_v10 = vpop.f32.mrb[0].mxu1 }
  0xd9   :  { %151 = vst.msk [vmem:[%s279_s2 + $0x8] sm:$0xff] %vm20_vm0, %v183_v9  ;;  %155 = vst.msk [vmem:[%s279_s2 + $0x28] sm:$0xff] %vm20_vm0, %v189_v10  ;;  %v111_v11 = vpop.f32.mrb[1].mxu0  ;;  %v131_v12 = vpop.f32.mrb[1].mxu1 }
  0xda   :  { %150 = vst.msk [vmem:[%s279_s2] sm:$0xff] %vm20_vm0, %v111_v11  ;;  %154 = vst.msk [vmem:[%s279_s2 + $0x20] sm:$0xff] %vm20_vm0, %v131_v12 }
  0xdc   :  { %v186_v13 = vpop.f32.mrb[2].mxu0  ;;  %v192_v14 = vpop.f32.mrb[2].mxu1 }
  0xdd   :  { %153 = vst.msk [vmem:[%s279_s2 + $0x18] sm:$0xff] %vm20_vm0, %v186_v13  ;;  %157 = vst.msk [vmem:[%s279_s2 + $0x38] sm:$0xff] %vm20_vm0, %v192_v14  ;;  %v121_v15 = vpop.f32.mrb[3].mxu0  ;;  %v141_v16 = vpop.f32.mrb[3].mxu1 }
  0xde   :  { %152 = vst.msk [vmem:[%s279_s2 + $0x10] sm:$0xff] %vm20_vm0, %v121_v15  ;;  %156 = vst.msk [vmem:[%s279_s2 + $0x30] sm:$0xff] %vm20_vm0, %v141_v16 }

</bundles_post_ra>
